<compile_context>
chip_gen: v5e
topology: v5e:2x2
jax: 0.10.0
libtpu: 0.0.40
codegen_flags: <defaults>
</compile_context>

<pallas_src>
import functools

import jax
import jax.numpy as jnp
import numpy as np
from jax.experimental import pallas as pl
from jax.experimental.pallas import tpu as pltpu


def _round_up(x, m):
    return ((x + m - 1) // m) * m


def sine_layer_kernel(x_ref, w_ref, b_ref, o_ref, *, omega_0, apply_omega):
    x = x_ref[...]                      # (tm, K)
    w = w_ref[...]                      # (K, Np)
    # MXU matmul with f32 accumulation (works for f32 or bf16 inputs).
    acc = jnp.dot(x, w, preferred_element_type=jnp.float32)      # (tm, Np) f32
    # Epilogue stays in f32 (v5e VPU/EUP have no bf16; also preserves precision
    # of the omega_0 * pre-activation before sin).
    pre = acc + b_ref[...].astype(jnp.float32)
    if apply_omega:                     # static (trace-time) branch
        pre = omega_0 * pre
    o_ref[...] = jnp.sin(pre).astype(o_ref.dtype)


def sine_layer(x, w_t, b, omega_0=30.0, *, tile_m=None,
               vmem_budget_bytes=48 * 1024 * 1024):
    """x: (M, K), w_t: (K, N) (transposed nn.Linear weight), b: (N,).

    Returns sin(omega_0 * (x @ w_t + b)) with dtype of x.
    """
    M, K = x.shape
    K2, N = w_t.shape
    assert K == K2, (K, K2)

    # ---- lane-dense output: pad N up to a multiple of 128 ------------------
    N_pad = _round_up(N, 128)
    if N_pad != N:
        w_t = jnp.pad(w_t, ((0, 0), (0, N_pad - N)))
        b = jnp.pad(b, (0, N_pad - N))
    b2d = b.reshape(1, N_pad)

    x_bytes = jnp.dtype(x.dtype).itemsize
    w_bytes = jnp.dtype(w_t.dtype).itemsize
    o_bytes = x_bytes  # output dtype == input dtype

    # ---- pick tile_m: multiple of sublane packing, fits VMEM budget --------
    sub = 16 if x.dtype == jnp.bfloat16 else 8
    if tile_m is None:
        tile_m = min(_round_up(M, sub), 1024)
    else:
        tile_m = max(sub, _round_up(int(tile_m), sub))

    def footprint(tm):
        # double-buffered x tile + y tile, weight/bias counted twice (safety).
        return (2 * tm * K * x_bytes + 2 * tm * N_pad * o_bytes
                + 2 * K * N_pad * w_bytes + 2 * N_pad * w_bytes)

    while tile_m > sub and footprint(tile_m) > vmem_budget_bytes:
        tile_m = max(sub, _round_up(tile_m // 2, sub))

    if tile_m >= M:
        tile_m = M  # single block spanning the whole batch is always legal

    grid = (pl.cdiv(M, tile_m),)

    kernel = functools.partial(
        sine_layer_kernel,
        omega_0=float(omega_0),
        apply_omega=(float(omega_0) != 1.0),
    )

    vmem_limit = int(min(max(2 * footprint(tile_m), 32 * 1024 * 1024),
                         100 * 1024 * 1024))

    cost = pl.CostEstimate(
        flops=2 * M * K * N_pad,
        transcendentals=M * N_pad,
        bytes_accessed=(M * K * x_bytes + K * N_pad * w_bytes
                        + N_pad * w_bytes + M * N_pad * o_bytes),
    )

    out = pl.pallas_call(
        kernel,
        out_shape=jax.ShapeDtypeStruct((M, N_pad), x.dtype),
        grid_spec=pltpu.PrefetchScalarGridSpec(
            num_scalar_prefetch=0,
            grid=grid,
            in_specs=[
                pl.BlockSpec((tile_m, K), lambda i: (i, 0)),     # x tile
                pl.BlockSpec((K, N_pad), lambda i: (0, 0)),      # full weight
                pl.BlockSpec((1, N_pad), lambda i: (0, 0)),      # bias row
            ],
            out_specs=pl.BlockSpec((tile_m, N_pad), lambda i: (i, 0)),
        ),
        compiler_params=pltpu.CompilerParams(
            dimension_semantics=("parallel",),
            vmem_limit_bytes=vmem_limit,
        ),
        cost_estimate=cost,
    )(x, w_t, b2d)

    if N_pad != N:
        out = out[:, :N]
    return out


def init_sine_layer_params(key, in_features, out_features, is_first, omega_0,
                           fold_omega_0=False):
    """Deterministic SIREN init matching SineLayer.init_weights.

    If fold_omega_0, omega_0 is baked into w/b at init time (call sine_layer
    with omega_0=1.0); mathematically identical, saves one VPU multiply/elem.
    """
    kw, kb = jax.random.split(key)
    if is_first:
        bound_w = 1.0 / in_features
    else:
        bound_w = np.sqrt(6.0 / in_features) / omega_0
    # nn.Linear weight is (out_features, in_features); store transposed.
    w = jax.random.uniform(
        kw, (out_features, in_features), jnp.float32, -bound_w, bound_w
    )
    # nn.Linear default bias init: U(-1/sqrt(in_features), 1/sqrt(in_features))
    bound_b = 1.0 / np.sqrt(in_features)
    b = jax.random.uniform(kb, (out_features,), jnp.float32, -bound_b, bound_b)
    w_t = w.T
    if fold_omega_0:
        w_t = w_t * omega_0
        b = b * omega_0
    return w_t, b  # (in_features, out_features), (out_features,)


if __name__ == "__main__":
    key = jax.random.PRNGKey(0)
    k_x, k_p = jax.random.split(key)

    # Small shapes that still exercise: N padding (48 -> 128), multi-step grid
    # (tile_m=16, M=40 -> 3 steps) and a ragged last block (40 % 16 != 0).
    batch = 40
    in_features = 32
    out_features = 48
    omega_0 = 30.0
    is_first = True

    x = jax.random.uniform(k_x, (batch, in_features), jnp.float32, -1.0, 1.0)
    w_t, b = init_sine_layer_params(k_p, in_features, out_features, is_first,
                                    omega_0)

    # Reference in plain JAX.
    y_ref = jnp.sin(omega_0 * (x @ w_t + b[None, :]))

    # Path 1: omega applied in-kernel.
    y = sine_layer(x, w_t, b, omega_0, tile_m=16)
    y = jax.block_until_ready(y)
    np.testing.assert_allclose(np.asarray(y), np.asarray(y_ref),
                               rtol=1e-5, atol=2e-5)

    # Path 2: omega folded into params at init -> kernel computes sin(acc + b).
    w_f, b_f = init_sine_layer_params(k_p, in_features, out_features, is_first,
                                      omega_0, fold_omega_0=True)
    y2 = sine_layer(x, w_f, b_f, omega_0=1.0, tile_m=16)
    y2 = jax.block_until_ready(y2)
    np.testing.assert_allclose(np.asarray(y2), np.asarray(y_ref),
                               rtol=1e-5, atol=2e-5)

    print("KERNEL_OK")
</pallas_src>

<mosaic_0001>
module attributes {stable_mosaic.version = 11 : i64} {
  func.func @sine_layer_kernel(%arg0: i32, %arg1: memref<16x32xf32, #tpu.memory_space<vmem>>, %arg2: memref<32x128xf32, #tpu.memory_space<vmem>>, %arg3: memref<1x128xf32, #tpu.memory_space<vmem>>, %arg4: memref<16x128xf32, #tpu.memory_space<vmem>>) attributes {dimension_semantics = [#tpu.dimension_semantics<parallel>], iteration_bounds = array<i64: 3>, scalar_prefetch = 0 : i64, scratch_operands = 0 : i64, tpu.core_type = #tpu.core_type<tc>, window_params = [{transform_indices = @transform_0, window_bounds = array<i64: 16, 32>}, {pipeline_mode = #tpu.pipeline_mode<synchronous>, transform_indices = @transform_1, window_bounds = array<i64: 32, 128>}, {pipeline_mode = #tpu.pipeline_mode<synchronous>, transform_indices = @transform_2, window_bounds = array<i64: 1, 128>}, {transform_indices = @transform_3, window_bounds = array<i64: 16, 128>}]} {
    %c0 = arith.constant 0 : index
    %c0_0 = arith.constant 0 : index
    %0 = vector.load %arg1[%c0, %c0_0] : memref<16x32xf32, #tpu.memory_space<vmem>>, vector<16x32xf32>
    %c0_1 = arith.constant 0 : index
    %c0_2 = arith.constant 0 : index
    %1 = vector.load %arg2[%c0_1, %c0_2] : memref<32x128xf32, #tpu.memory_space<vmem>>, vector<32x128xf32>
    %cst = arith.constant dense<0.000000e+00> : vector<16x128xf32>
    %2 = tpu.matmul %0, %1, %cst {dimension_numbers = #tpu.dot_dimension_numbers<[1], [0], [0], [1], [0, 0, 1, 1], [], []>} : vector<16x32xf32>, vector<32x128xf32>, vector<16x128xf32> -> vector<16x128xf32>
    %c0_3 = arith.constant 0 : index
    %c0_4 = arith.constant 0 : index
    %3 = vector.load %arg3[%c0_3, %c0_4] : memref<1x128xf32, #tpu.memory_space<vmem>>, vector<1x128xf32>
    %4 = vector.broadcast %3 : vector<1x128xf32> to vector<16x128xf32>
    %5 = arith.addf %2, %4 : vector<16x128xf32>
    %cst_5 = arith.constant 3.000000e+01 : f32
    %6 = vector.broadcast %cst_5 : f32 to vector<16x128xf32>
    %7 = arith.mulf %6, %5 : vector<16x128xf32>
    %8 = math.sin %7 : vector<16x128xf32>
    %c0_6 = arith.constant 0 : index
    %c0_7 = arith.constant 0 : index
    %9 = vector.load %arg4[%c0_6, %c0_7] : memref<16x128xf32, #tpu.memory_space<vmem>>, vector<16x128xf32>
    tpu.vector_store %arg4[%c0_6, %c0_7], %8 {strides = array<i32>} : memref<16x128xf32, #tpu.memory_space<vmem>>, vector<16x128xf32>,
    return
  }
  func.func @transform_0(%arg0: i32) -> (i32, i32) {
    %c0_i32 = arith.constant 0 : i32
    %c0_i32_0 = arith.constant 0 : i32
    return %arg0, %c0_i32 : i32, i32
  }
  func.func @transform_1(%arg0: i32) -> (i32, i32) {
    %c0_i32 = arith.constant 0 : i32
    %c0_i32_0 = arith.constant 0 : i32
    %c0_i32_1 = arith.constant 0 : i32
    return %c0_i32, %c0_i32_0 : i32, i32
  }
  func.func @transform_2(%arg0: i32) -> (i32, i32) {
    %c0_i32 = arith.constant 0 : i32
    %c0_i32_0 = arith.constant 0 : i32
    %c0_i32_1 = arith.constant 0 : i32
    return %c0_i32, %c0_i32_0 : i32, i32
  }
  func.func @transform_3(%arg0: i32) -> (i32, i32) {
    %c0_i32 = arith.constant 0 : i32
    %c0_i32_0 = arith.constant 0 : i32
    return %arg0, %c0_i32 : i32, i32
  }
}

</mosaic_0001>

<bundles_post_ra>
// kernel: tpu_custom_call.1
= control target key start
LH: loop header
LB: loop body
LE: loop exit
PB: predicated region body
PF: predicated region fallthrough
CT: control target
= control target key end

     0   :  { %8 = vsyncpa [#allocation3], 0  ;;  %s1140_s0 = inlined_call_operand.vmem [shape: f32[40,32], index: 0, kind: input, shape index: {}]   ;;  %s1141_s1 = inlined_call_operand.vmem [shape: f32[32,128], index: 1, kind: input, shape index: {}]   ;;  %s1142_s2 = inlined_call_operand.vmem [shape: f32[1,128], index: 2, kind: input, shape index: {}]   ;;  %s1143_s3 = inlined_call_operand.hbm [shape: f32[40,128], index: 3, kind: output, shape index: {}]  }
   0x1   :  { %10 = vsyncpa [#allocation3 + $0x1], 0  ;;  %s817_s12 = smov 0   ;;  %s819_s13 = smov 0  }
   0x2   :  { %s821_s14 = smov 0   ;;  %s823_s15 = smov 0  }
   0x3 LB: > { %s838_s16 = sadd.s32 4294967295, %s785_s15   ;;  %s635_s17 = sadd.s32 4294967294, %s785_s15   ;;  %s785_s15 = sphi %s823_s15, %s1154_s15   ;;  %s781_s14 = sphi %s821_s14, %s1153_s14   ;;  %s777_s13 = sphi %s819_s13, %s1152_s13   ;;  %s773_s12 = sphi %s817_s12, %s1151_s12  }
   0x4   : > { %s842_s18 = sadd.s32 1, %s785_s15   ;;  %s91_s19 = sadd.s32 1, %s781_s14 }
   0x5   : > { %s88_s20 = ssub.s32 %s785_s15, %s842_s18  ;;  %p101_p0 = scmp.ne.s32.totalorder %s781_s14, %s777_s13 }
   0x6   : > { %p89_p1 = scmp.eq.s32.totalorder %s88_s20, 0  ;;  %p102_p2 = scmp.eq.s32.totalorder %s838_s16, 2 }
   0x7   : > { %p107_p3 = scmp.ne.s32.totalorder %s777_s13, %s773_s12  ;;  %p108_p4 = scmp.eq.s32.totalorder %s635_s17, 2 }
   0x8   : > { %s853_s21 = scalar_select %p89_p1, %s781_s14, %s91_s19  }
   0x9   : > { %p855_p5 = por %p102_p2, %p101_p0  ;;  %p859_p6 = por %p108_p4, %p107_p3 }
   0xa   : > { %p638_p7 = scmp.ge.s32.totalorder %s785_s15, 1  ;;  %p149_p8 = scmp.lt.s32.totalorder %s785_s15, 4 }
   0xc   : > { %p150_p9 = pnand %p638_p7, %p149_p8 }
   0xd   : > { %s872_s28 = sshll.u32 (!%p150_p9), %s838_s16, 1  ;;  %s174_s11 = sand.u32 (!%p150_p9), 1, %s777_s13  }
   0xe   : > { %153 = sbr.rel (%p150_p9) target bundleno = 302 (0x12e), region = 32  ;;  %p182_p10 = scmp.lt.s32.totalorder (!%p150_p9), %s872_s28, 4 }
   0xf   : > { %s639_s20 = sshll.u32 (!%p150_p9), %s174_s11, 4  ;;  %s1079_s25 = scalar_lea.sflag (!%p150_p9), [#allocation3], %s174_s11 }
  0x10   : > { %s1067_s24 = scalar_lea.vmem (!%p150_p9), [#allocation2], %s639_s20 }
  0x13   : > { %v201_v0 = vld [vmem:[%s1141_s1 + $0x18] sm:$0xff]  ;;  %v200_v1 = vld [vmem:[%s1141_s1 + $0x10] sm:$0xff]  ;;  %v199_v2 = vld [vmem:[%s1141_s1 + $0x8] sm:$0xff]  ;;  %s183_s4 = scalar_select %p182_p10, %s872_s28, 4  ;;  %vm206_vm0 = vcmask 261120  }
  0x14   : > { %225 = vmatpush.msra.mxu0 %v201_v0  ;;  %660 = vmatpush.msra.mxu1 %v201_v0  ;;  %v198_v3 = vld [vmem:[%s1141_s1] sm:$0xff]  ;;  %v787_v36 = vmov 683565275   ;;  %v788_v38 = vmov 2475754826   ;;  %s559_s26 = ssub.s32 (%p855_p5), 5, %s872_s28 }
  0x15   : > { %s641_s7 = sshll.u32 %s183_s4, 3  ;;  %v711_v6 = vld [vmem:[%s1142_s2] ss:$0 sm:$0xff]  ;;  %v789_v42 = vmov 2131351028   ;;  %p560_p11 = scmp.lt.s32.totalorder (%p855_p5), %s559_s26, 2 }
  0x16   : > { %226 = vmatpush.msra.mxu0 %v200_v1  ;;  %661 = vmatpush.msra.mxu1 %v200_v1  ;;  %s185_s10 = scalar_lea.vmem %s1140_s0, %s641_s7  ;;  %v790_v45 = vmov 2102212464   ;;  %v791_v48 = vmov 920167782   ;;  %v792_v51 = vmov 1326507024  }
  0x17   : > { %v196_v4 = vld [vmem:[%s185_s10] sm:$0xff]  ;;  %v197_v5 = vld [vmem:[%s185_s10 + $0x8] sm:$0xff] }
  0x18   : > { %227 = vmatpush.msra.mxu0 %v199_v2  ;;  %662 = vmatpush.msra.mxu1 %v199_v2 }
  0x1a   : > { %228 = vmatpush.msra.mxu0 %v198_v3  ;;  %663 = vmatpush.msra.mxu1 %v198_v3 }
  0x1b   : > { %642 = vmatmul.msk.f32.vlgmr.msra.gmra.mxu0 %vm206_vm0, %v196_v4  ;;  %643 = vmatmul.msk.f32.vlgmr.msra.gmra.mxu1 %vm206_vm0, %v197_v5 }
  0x98   : > { %v230_v7 = vpop.f32.mrf.mxu0  ;;  %v233_v8 = vpop.f32.mrf.mxu1 }
  0x99   : > { %v231_v9 = vadd.f32 %v711_v6, %v230_v7  ;;  %v234_v10 = vadd.f32 %v711_v6, %v233_v8 }
  0x9b   : > { %v889_v11 = vmul.f32 30.0, %v231_v9  ;;  %v891_v12 = vmul.f32 30.0, %v234_v10 }
  0x9d   : > { %v238_v13 = vand.u32 2147483647, %v889_v11  ;;  %v241_v14 = vand.u32 2139095040, %v889_v11  ;;  %v393_v15 = vand.u32 2147483647, %v891_v12  ;;  %v396_v16 = vand.u32 2139095040, %v891_v12 }
  0x9f   : > { %v242_v17 = vshrl.u32 %v241_v14, 23  ;;  %v245_v18 = vand.u32 8388607, %v238_v13  ;;  %v397_v19 = vshrl.u32 %v396_v16, 23  ;;  %v400_v22 = vand.u32 8388607, %v393_v15 }
  0xa1   : > { %v644_v20 = vadd.s32 4294967169, %v242_v17  ;;  %v246_v21 = vor.u32 8388608, %v245_v18  ;;  %v647_v23 = vadd.s32 4294967169, %v397_v19  ;;  %v401_v27 = vor.u32 8388608, %v400_v22 }
  0xa3   : > { %v248_v24 = vadd.s32 1, %v644_v20  ;;  %v403_v25 = vadd.s32 1, %v647_v23  ;;  %v901_v26 = vshll.u32 %v246_v21, 8  ;;  %v908_v34 = vshll.u32 %v401_v27, 8 }
  0xa5   : > { %vm249_vm1 = vcmp.gt.s32.totalorder %v248_v24, 0  ;;  %vm404_vm2 = vcmp.gt.s32.totalorder %v403_v25, 0  ;;  %v904_v32 = vand.u32 65535, %v901_v26  ;;  %v288_v40 = vshrl.u32 %v901_v26, 16 }
  0xa6   : > { %v250_v28 = vsel %vm249_vm1, %v248_v24, 0  ;;  %v405_v30 = vsel %vm404_vm2, %v403_v25, 0 }
  0xa7   : > { %v252_v29 = vand.u32 31, %v250_v28  ;;  %v906_v33 = vand.u32 31, %v405_v30  ;;  %v910_v35 = vshrl.u32 %v250_v28, 5  ;;  %v948_v19 = vshrl.u32 %v405_v30, 5 }
  0xa9   : > { %v253_v31 = vsub.s32 32, %v252_v29  ;;  %v255_v37 = vshll.u32 %v787_v36, %v252_v29  ;;  %v258_v39 = vshll.u32 %v788_v38, %v252_v29  ;;  %v261_v44 = vshll.u32 %v789_v42, %v252_v29 }
  0xaa   : > { %v264_v47 = vshll.u32 %v790_v45, %v252_v29  ;;  %v267_v50 = vshll.u32 %v791_v48, %v252_v29  ;;  %v920_v56 = vsub.s32 32, %v906_v33  ;;  %vm270_vm3 = vcmp.lt.s32.totalorder %v910_v35, 1 }
  0xab   : > { %v256_v41 = vshrl.u32 %v788_v38, %v253_v31  ;;  %v259_v43 = vshrl.u32 %v789_v42, %v253_v31  ;;  %v262_v46 = vshrl.u32 %v790_v45, %v253_v31  ;;  %v265_v49 = vshrl.u32 %v791_v48, %v253_v31 }
  0xac   : > { %v268_v52 = vshrl.u32 %v792_v51, %v253_v31  ;;  %vm271_vm4 = vcmp.lt.s32.totalorder %v910_v35, 2  ;;  %v254_v59 = vshrl.u32 %v787_v36, %v253_v31  ;;  %vm273_vm5 = vcmp.lt.s32.totalorder %v910_v35, 4 }
  0xad   : > { %v257_v53 = vor.u32 %v256_v41, %v255_v37  ;;  %v260_v54 = vor.u32 %v259_v43, %v258_v39  ;;  %v263_v55 = vor.u32 %v262_v46, %v261_v44  ;;  %v266_v57 = vor.u32 %v265_v49, %v264_v47 }
  0xae   : > { %v269_v58 = vor.u32 %v268_v52, %v267_v50  ;;  %vm272_vm6 = vcmp.lt.s32.totalorder %v910_v35, 3  ;;  %v410_v0 = vshll.u32 %v787_v36, %v906_v33  ;;  %v411_v4 = vshrl.u32 %v788_v38, %v920_v56 }
  0xaf   : > { %v278_v60 = vsel %vm270_vm3, %v257_v53, %v260_v54  ;;  %v282_v61 = vsel %vm270_vm3, %v260_v54, %v263_v55  ;;  %v279_v62 = vsel %vm273_vm5, %v266_v57, 920167782  ;;  %v275_v1 = vsel %vm273_vm5, %v263_v55, 2102212464 }
  0xb0   : > { %v283_v63 = vsel %vm273_vm5, %v269_v58, 1326507024  ;;  %v280_v2 = vsel %vm272_vm6, %v263_v55, %v279_v62  ;;  %v413_v7 = vshll.u32 %v788_v38, %v906_v33  ;;  %v414_v8 = vshrl.u32 %v789_v42, %v920_v56 }
  0xb1   : > { %v284_v3 = vsel %vm272_vm6, %v266_v57, %v283_v63  ;;  %v281_v5 = vsel %vm271_vm4, %v278_v60, %v280_v2  ;;  %v274_v17 = vsel %vm270_vm3, %v254_v59, %v257_v53  ;;  %v276_v18 = vsel %vm272_vm6, %v260_v54, %v275_v1 }
  0xb2   : > { %v285_v6 = vsel %vm271_vm4, %v282_v61, %v284_v3  ;;  %v311_v14 = vand.u32 65535, %v281_v5  ;;  %v312_v16 = vshrl.u32 %v281_v5, 16  ;;  %v950_v20 = vor.u32 %v411_v4, %v410_v0 }
  0xb3   : > { %v289_v9 = vand.u32 65535, %v285_v6  ;;  %v290_v10 = vshrl.u32 %v285_v6, 16  ;;  %v953_v23 = vor.u32 %v414_v8, %v413_v7  ;;  %v417_v24 = vshrl.u32 %v790_v45, %v920_v56 }
  0xb4   : > { %v314_v27 = vmul.u32 %v312_v16, %v904_v32  ;;  %v315_v28 = vmul.u32 %v311_v14, %v288_v40  ;;  %v416_v29 = vshll.u32 %v789_v42, %v906_v33  ;;  %v313_v37 = vmul.u32 %v311_v14, %v904_v32 }
  0xb5   : > { %v292_v21 = vmul.u32 %v290_v10, %v904_v32  ;;  %v293_v22 = vmul.u32 %v289_v9, %v288_v40  ;;  %v291_v25 = vmul.u32 %v289_v9, %v904_v32  ;;  %v294_v31 = vmul.u32 %v290_v10, %v288_v40 }
  0xb6   : > { %v316_v38 = vmul.u32 %v312_v16, %v288_v40  ;;  %v317_v44 = vshll.u32 %v314_v27, 16  ;;  %v319_v47 = vshll.u32 %v315_v28, 16  ;;  %v961_v49 = vor.u32 %v417_v24, %v416_v29 }
  0xb7   : > { %v295_v30 = vshll.u32 %v292_v21, 16  ;;  %v296_v39 = vshrl.u32 %v292_v21, 16  ;;  %v297_v41 = vshll.u32 %v293_v22, 16  ;;  %v298_v43 = vshrl.u32 %v293_v22, 16 }
  0xb8   : > { %v793_v50 = vmov 0   ;;  %vm321_vm8 = vc.u32 %v313_v37, %v317_v44  ;;  %v323_v53 = vadd.s32 %v317_v44, %v313_v37  ;;  %v420_v42 = vshrl.u32 %v791_v48, %v920_v56 }
  0xb9   : > { %vm299_vm7 = vc.u32 %v291_v25, %v295_v30  ;;  %v301_v46 = vadd.s32 %v295_v30, %v291_v25  ;;  %v322_v32 = vsel %vm321_vm8, 1, %v793_v50  ;;  %v419_v40 = vshll.u32 %v790_v45, %v906_v33 }
  0xba   : > { %v300_v52 = vsel %vm299_vm7, 1, %v793_v50  ;;  %v324_v57 = vadd.s32 %v322_v32, %v316_v38  ;;  %vm325_vm10 = vc.u32 %v323_v53, %v319_v47  ;;  %v422_v58 = vshll.u32 %v791_v48, %v906_v33 }
  0xbb   : > { %v302_v54 = vadd.s32 %v300_v52, %v294_v31  ;;  %vm303_vm9 = vc.u32 %v301_v46, %v297_v41  ;;  %v326_v60 = vsel %vm325_vm10, 1, %v793_v50  ;;  %v421_v61 = vor.u32 %v420_v42, %v419_v40 }
  0xbc   : > { %v304_v55 = vsel %vm303_vm9, 1, %v793_v50  ;;  %v423_v62 = vshrl.u32 %v792_v51, %v920_v56  ;;  %v318_v63 = vshrl.u32 %v314_v27, 16  ;;  %v320_v0 = vshrl.u32 %v315_v28, 16 }
  0xbd   : > { %v306_v59 = vadd.s32 %v304_v55, %v302_v54  ;;  %v975_v1 = vadd.s32 %v323_v53, %v319_v47  ;;  %v328_v2 = vadd.s32 %v326_v60, %v324_v57  ;;  %vm425_vm11 = vcmp.lt.s32.totalorder %v948_v19, 1 }
  0xbe   : > { %v424_v3 = vor.u32 %v423_v62, %v422_v58  ;;  %vm428_vm12 = vcmp.lt.s32.totalorder %v948_v19, 4  ;;  %vm427_vm13 = vcmp.lt.s32.totalorder %v948_v19, 3  ;;  %v433_v33 = vsel %vm425_vm11, %v950_v20, %v953_v23 }
  0xbf   : > { %v307_v45 = vadd.s32 %v306_v59, %v296_v39  ;;  %v329_v4 = vadd.s32 %v328_v2, %v318_v63  ;;  %v434_v48 = vsel %vm428_vm12, %v421_v61, 920167782  ;;  %vm426_vm14 = vcmp.lt.s32.totalorder %v948_v19, 2 }
  0xc0   : > { %v435_v5 = vsel %vm427_vm13, %v961_v49, %v434_v48  ;;  %v437_v6 = vsel %vm425_vm11, %v953_v23, %v961_v49  ;;  %v277_v7 = vsel %vm271_vm4, %v274_v17, %v276_v18  ;;  %v438_v10 = vsel %vm428_vm12, %v424_v3, 1326507024 }
  0xc1   : > { %v986_v51 = vadd.s32 %v307_v45, %v298_v43  ;;  %v330_v8 = vadd.s32 %v329_v4, %v320_v0  ;;  %v436_v9 = vsel %vm426_vm14, %v433_v33, %v435_v5  ;;  %v439_v14 = vsel %vm427_vm13, %v421_v61, %v438_v10 }
  0xc2   : > { %v442_v16 = vand.u32 65535, %v908_v34  ;;  %v466_v21 = vand.u32 65535, %v436_v9  ;;  %v440_v35 = vsel %vm426_vm14, %v437_v6, %v439_v14  ;;  %v443_v17 = vshrl.u32 %v908_v34, 16 }
  0xc3   : > { %vm333_vm15 = vc.u32 %v986_v51, %v975_v1  ;;  %v334_v22 = vadd.s32 1, %v330_v8  ;;  %v467_v18 = vshrl.u32 %v436_v9, 16  ;;  %v331_v24 = vmul.u32 %v901_v26, %v277_v7 }
  0xc4   : > { %v444_v25 = vand.u32 65535, %v440_v35  ;;  %v445_v27 = vshrl.u32 %v440_v35, 16  ;;  %v470_v31 = vmul.u32 %v466_v21, %v443_v17  ;;  %v468_v39 = vmul.u32 %v466_v21, %v442_v16 }
  0xc5   : > { %v335_v28 = vsel %vm333_vm15, %v334_v22, %v330_v8  ;;  %v469_v29 = vmul.u32 %v467_v18, %v442_v16  ;;  %v471_v41 = vmul.u32 %v467_v18, %v443_v17  ;;  %v430_v59 = vsel %vm428_vm12, %v961_v49, 2102212464 }
  0xc6   : > { %v336_v30 = vadd.s32 %v335_v28, %v331_v24  ;;  %v447_v37 = vmul.u32 %v445_v27, %v442_v16  ;;  %v448_v38 = vmul.u32 %v444_v25, %v443_v17  ;;  %v446_v46 = vmul.u32 %v444_v25, %v442_v16 }
  0xc7   : > { %v472_v43 = vshll.u32 %v469_v29, 16  ;;  %v449_v47 = vmul.u32 %v445_v27, %v443_v17  ;;  %v474_v42 = vshll.u32 %v470_v31, 16  ;;  %v409_v61 = vshrl.u32 %v787_v36, %v920_v56 }
  0xc8   : > { %v337_v44 = vadd.s32 536870912, %v336_v30  ;;  %v450_v52 = vshll.u32 %v447_v37, 16  ;;  %v452_v53 = vshll.u32 %v448_v38, 16  ;;  %v451_v2 = vshrl.u32 %v447_v37, 16 }
  0xc9   : > { %vm476_vm0 = vc.u32 %v468_v39, %v472_v43  ;;  %v478_v54 = vadd.s32 %v472_v43, %v468_v39  ;;  %v429_v4 = vsel %vm425_vm11, %v409_v61, %v950_v20  ;;  %v431_v49 = vsel %vm427_vm13, %v953_v23, %v430_v59 }
  0xca   : > { %v1011_v26 = vshrl.u32 %v337_v44, 30  ;;  %vm454_vm1 = vc.u32 %v446_v46, %v450_v52  ;;  %v456_v32 = vadd.s32 %v450_v52, %v446_v46  ;;  %v477_v40 = vsel %vm476_vm0, 1, %v793_v50 }
  0xcb   : > { %v455_v55 = vsel %vm454_vm1, 1, %v793_v50  ;;  %v479_v57 = vadd.s32 %v477_v40, %v471_v41  ;;  %vm480_vm2 = vc.u32 %v478_v54, %v474_v42  ;;  %v473_v33 = vshrl.u32 %v469_v29, 16 }
  0xcc   : > { %v339_v58 = vshll.u32 %v1011_v26, 30  ;;  %v457_v60 = vadd.s32 %v455_v55, %v449_v47  ;;  %vm458_vm3 = vc.u32 %v456_v32, %v452_v53  ;;  %v481_v63 = vsel %vm480_vm2, 1, %v793_v50 }
  0xcd   : > { %v459_v62 = vsel %vm458_vm3, 1, %v793_v50  ;;  %v483_v3 = vadd.s32 %v481_v63, %v479_v57  ;;  %v453_v36 = vshrl.u32 %v448_v38, 16  ;;  %v475_v5 = vshrl.u32 %v470_v31, 16 }
  0xce   : > { %v340_v0 = vsub.s32 %v336_v30, %v339_v58  ;;  %v461_v45 = vadd.s32 %v459_v62, %v457_v60  ;;  %v432_v9 = vsel %vm426_vm14, %v429_v4, %v431_v49  ;;  %v482_v10 = vadd.s32 %v478_v54, %v474_v42 }
  0xcf   : > { %v484_v6 = vadd.s32 %v483_v3, %v473_v33  ;;  %v486_v23 = vmul.u32 %v908_v34, %v432_v9  ;;  %v332_v17 = vadd.s32 %v975_v1, %v986_v51  ;;  %vm240_vm8 = vcmp.lt.s32.totalorder %v889_v11, 0 }
  0xd0   : > { %vm341_vm4 = vcmp.lt.s32.totalorder %v340_v0, 0  ;;  %v342_v48 = vsub.s32 0, %v340_v0  ;;  %v462_v56 = vadd.s32 %v461_v45, %v451_v2  ;;  %vm1040_vm9 = vcmp.le.f32.partialorder %v238_v13, 0.7853982 }
  0xd1   : > { %v485_v14 = vadd.s32 %v484_v6, %v475_v5  ;;  %v362_v42 = vsub.s32 4, %v1011_v26  ;;  %vm1055_vm11 = vcmp.le.f32.partialorder %v393_v15, 0.7853982  ;;  %vm395_vm12 = vcmp.lt.s32.totalorder %v891_v12, 0 }
  0xd2   : > { %v343_v50 = vsel %vm341_vm4, %v342_v48, %v340_v0  ;;  %v463_v7 = vadd.s32 %v462_v56, %v453_v36  ;;  %vm381_vm0 = vweird.f32 %v889_v11  ;;  %vm536_vm4 = vweird.f32 %v891_v12 }
  0xd3   : > { %v344_v8 = vclz %v343_v50  ;;  %v489_v16 = vadd.s32 1, %v485_v14  ;;  %v363_v13 = vsel %vm240_vm8, %v362_v42, %v1011_v26 }
  0xd4   : > { %vm488_vm5 = vc.u32 %v463_v7, %v482_v10  ;;  %v487_v58 = vadd.s32 %v482_v10, %v463_v7  ;;  %v365_v45 = vsel %vm1040_vm9, 0, %v363_v13 }
  0xd5   : > { %v645_v20 = vadd.s32 4294967294, %v344_v8  ;;  %v490_v21 = vsel %vm488_vm5, %v489_v16, %v485_v14  ;;  %v382_v56 = vadd.s32 3, %v365_v45 }
  0xd6   : > { %v491_v35 = vadd.s32 %v490_v21, %v486_v23 }
  0xd7   : > { %vm646_vm6 = vcmp.lt.s32.totalorder %v645_v20, 0  ;;  %v383_v10 = vand.u32 3, %v382_v56 }
  0xd8   : > { %v347_v22 = vsel %vm646_vm6, 0, %v645_v20  ;;  %v492_v25 = vadd.s32 536870912, %v491_v35 }
  0xd9   : > { %v348_v18 = vsub.s32 32, %v347_v22  ;;  %v352_v24 = vsub.s32 4294967266, %v347_v22  ;;  %v349_v27 = vshll.u32 %v340_v0, %v347_v22  ;;  %vm384_vm13 = vcmp.lt.s32.totalorder %v383_v10, 2 }
  0xda   : > { %v1034_v29 = vshrl.u32 %v492_v25, 30  ;;  %vm385_vm14 = vcmp.eq.s32.totalorder %v383_v10, 0  ;;  %vm388_vm15 = vcmp.eq.s32.totalorder %v383_v10, 2 }
  0xdb   : > { %v350_v19 = vshrl.u32 %v332_v17, %v348_v18  ;;  %v353_v28 = vadd.s32 127, %v352_v24 }
  0xdc   : > { %v494_v37 = vshll.u32 %v1034_v29, 30  ;;  %v517_v24 = vsub.s32 4, %v1034_v29 }
  0xdd   : > { %v351_v31 = vor.u32 %v350_v19, %v349_v27  ;;  %v354_v30 = vshll.u32 %v353_v28, 23 }
  0xde   : > { %v495_v38 = vsub.s32 %v491_v35, %v494_v37 }
  0xdf   : > { %v355_v34 = vor.u32 4788187, %v354_v30  ;;  %v358_v41 = vcvt.s32.f32 %v351_v31  ;;  %v518_v30 = vsel %vm395_vm12, %v517_v24, %v1034_v29 }
  0xe0   : > { %vm496_vm7 = vcmp.lt.s32.totalorder %v495_v38, 0  ;;  %v497_v43 = vsub.s32 0, %v495_v38 }
  0xe1   : > { %v356_v39 = vand.u32 2147483647, %v355_v34 }
  0xe2   : > { %v498_v1 = vsel %vm496_vm7, %v497_v43, %v495_v38 }
  0xe3   : > { %v359_v44 = vmul.f32 %v358_v41, %v356_v39  ;;  %v499_v46 = vclz %v498_v1 }
  0xe5   : > { %v360_v51 = vxor.u32 2147483648, %v359_v44  ;;  %v648_v53 = vadd.s32 4294967294, %v499_v46 }
  0xe7   : > { %v361_v52 = vsel %vm240_vm8, %v360_v51, %v359_v44  ;;  %vm649_vm10 = vcmp.lt.s32.totalorder %v648_v53, 0 }
  0xe8   : > { %v364_v54 = vsel %vm1040_vm9, %v889_v11, %v361_v52  ;;  %v502_v40 = vsel %vm649_vm10, 0, %v648_v53 }
  0xe9   : > { %v366_v32 = vmul.f32 %v364_v54, %v364_v54  ;;  %v503_v59 = vsub.s32 32, %v502_v40  ;;  %v507_v60 = vsub.s32 4294967266, %v502_v40  ;;  %v504_v0 = vshll.u32 %v495_v38, %v502_v40 }
  0xea   : > { %v520_v38 = vsel %vm1055_vm11, 0, %v518_v30 }
  0xeb   : > { %v367_v55 = vmul.f32 -0.001358992, %v366_v32  ;;  %v374_v57 = vmul.f32 -0.00019511016, %v366_v32  ;;  %v505_v63 = vshrl.u32 %v487_v58, %v503_v59  ;;  %v508_v2 = vadd.s32 127, %v507_v60 }
  0xec   : > { %v537_v44 = vadd.s32 3, %v520_v38 }
  0xed   : > { %v368_v61 = vadd.f32 0.041655596, %v367_v55  ;;  %v375_v62 = vadd.f32 0.008332121, %v374_v57  ;;  %v506_v49 = vor.u32 %v505_v63, %v504_v0  ;;  %v509_v33 = vshll.u32 %v508_v2, 23 }
  0xee   : > { %v538_v52 = vand.u32 3, %v537_v44 }
  0xef   : > { %v369_v3 = vmul.f32 %v368_v61, %v366_v32  ;;  %v376_v4 = vmul.f32 %v375_v62, %v366_v32  ;;  %v510_v5 = vor.u32 4788187, %v509_v33  ;;  %v513_v7 = vcvt.s32.f32 %v506_v49 }
  0xf0   : > { %vm540_vm1 = vcmp.eq.s32.totalorder %v538_v52, 0  ;;  %vm543_vm2 = vcmp.eq.s32.totalorder %v538_v52, 2  ;;  %vm539_vm3 = vcmp.lt.s32.totalorder %v538_v52, 2 }
  0xf1   : > { %v370_v48 = vadd.f32 -0.4999988, %v369_v3  ;;  %v377_v36 = vadd.f32 -0.16666654, %v376_v4  ;;  %v511_v50 = vand.u32 2147483647, %v510_v5 }
  0xf3   : > { %v371_v6 = vmul.f32 %v370_v48, %v366_v32  ;;  %v378_v26 = vmul.f32 %v377_v36, %v366_v32  ;;  %v514_v14 = vmul.f32 %v513_v7, %v511_v50 }
  0xf5   : > { %v372_v8 = vadd.f32 1.0, %v371_v6  ;;  %v379_v9 = vadd.f32 1.0, %v378_v26  ;;  %v515_v23 = vxor.u32 2147483648, %v514_v14 }
  0xf7   : > { %v380_v20 = vmul.f32 %v379_v9, %v364_v54  ;;  %v389_v16 = vxor.u32 2147483648, %v372_v8  ;;  %v516_v35 = vsel %vm395_vm12, %v515_v23, %v514_v14 }
  0xf8   : > { %v519_v25 = vsel %vm1055_vm11, %v891_v12, %v516_v35 }
  0xf9   : > { %v386_v21 = vxor.u32 2147483648, %v380_v20  ;;  %v390_v18 = vsel %vm388_vm15, %v389_v16, %v380_v20  ;;  %v521_v27 = vmul.f32 %v519_v25, %v519_v25 }
  0xfb   : > { %v387_v17 = vsel %vm385_vm14, %v372_v8, %v386_v21  ;;  %v522_v28 = vmul.f32 -0.001358992, %v521_v27  ;;  %v529_v31 = vmul.f32 -0.00019511016, %v521_v27 }
  0xfc   : > { %v391_v15 = vsel %vm384_vm13, %v387_v17, %v390_v18 }
  0xfd   : > { %v392_v19 = vsel %vm381_vm0, nan, %v391_v15  ;;  %v523_v37 = vadd.f32 0.041655596, %v522_v28  ;;  %v530_v34 = vadd.f32 0.008332121, %v529_v31 }
  0xfe   : > { %548 = vst [vmem:[%s1067_s24] sm:$0xff] %v392_v19 }
  0xff   : > { %v524_v39 = vmul.f32 %v523_v37, %v521_v27  ;;  %v531_v11 = vmul.f32 %v530_v34, %v521_v27 }
 0x101   : > { %v525_v41 = vadd.f32 -0.4999988, %v524_v39  ;;  %v532_v43 = vadd.f32 -0.16666654, %v531_v11 }
 0x103   : > { %v526_v1 = vmul.f32 %v525_v41, %v521_v27  ;;  %v533_v51 = vmul.f32 %v532_v43, %v521_v27 }
 0x105   : > { %v527_v46 = vadd.f32 1.0, %v526_v1  ;;  %v534_v47 = vadd.f32 1.0, %v533_v51 }
 0x107   : > { %v535_v53 = vmul.f32 %v534_v47, %v519_v25  ;;  %v544_v42 = vxor.u32 2147483648, %v527_v46 }
 0x109   : > { %v541_v29 = vxor.u32 2147483648, %v535_v53  ;;  %v545_v32 = vsel %vm543_vm2, %v544_v42, %v535_v53 }
 0x10a   : > { %557 = sbr.rel (!%p855_p5) target bundleno = 302 (0x12e), region = 36 }
 0x10b   : > { %v542_v54 = vsel %vm540_vm1, %v527_v46, %v541_v29 }
 0x10c   : > { %v546_v40 = vsel %vm539_vm3, %v542_v54, %v545_v32 }
 0x10d   : > { %v547_v55 = vsel %vm536_vm4, nan, %v546_v40 }
 0x10e   : > { %549 = vst [vmem:[%s1067_s24 + $0x8] sm:$0xff] %v547_v55 }
 0x10f   : > { %s1156_s26 = smov (!%p560_p11, %s559_s26), 2 }
 0x110   : > { %s652_s27 = sshll.u32 %s1156_s26, 3 }
 0x111   : > { %s563_s29 = ssub.s32 16, %s652_s27 }
 0x112   : > { %s564_s30 = sshll.u32 %s563_s29, 4 }
 0x113   : > { %565 = vsyncadd %s1079_s25, %s564_s30  ;;  %p1088_p12 = scmp.ne.s32.totalorder %s652_s27, 0  ;;  %s659_s22 = sshll.u32 %s838_s16, 4 }
 0x114   : > { %s568_s6 = scalar_lea.hbm %s1143_s3, %s659_s22  ;;  %s570_s7 = sshll.u32 %s1067_s24, 4  ;;  %s1097_s7 = int_to_ptr.vmem [resolvable:$true] %s570_s7 }
 0x115   : > { %s572_s8 = sshll.u32 %s568_s6, 4  ;;  %s656_s9 = sshll.u32 %s1156_s26, 7  ;;  %s1099_s8 = int_to_ptr.hbm [resolvable:$true] %s572_s8 }
 0x116   : > { %s712_s10 = sshra.s32 %s1097_s7, 4  ;;  %s714_s11 = sshrl.u32 %s656_s9, 4  ;;  %s713_s10 = int_to_ptr.vmem [resolvable:$true] %s712_s10 }
 0x117   : > { %s719_s17 = scalar_lea.vmem %s713_s10, %s714_s11  ;;  %s794_s16 = smov [#allocation2]  }
 0x118   : > { %p720_p13 = scmp.ne.s32.totalorder %s713_s10, %s719_s17  ;;  %s723_s19 = scalar_lea.vmem %s794_s16, 32 }
 0x119   : > { %p725_p2 = scmp.lt.s32.totalorder %s723_s19, %s719_s17 }
 0x11a   : > { %p721_p0 = pnand %p720_p13, %p1088_p12 }
 0x11c   : > { %p722_p1 = pneg %p721_p0 }
 0x11e   : > { %p727_p3 = pnand %p725_p2, %p722_p1 }
 0x120   : > { %730 = shalt.err (!%p727_p3)
}
 0x121   : > { %s731_s20 = sshra.s32 %s1099_s8, 4  ;;  %s742_s30 = scalar_lea.hbm %s1143_s3, 40  ;;  %s732_s20 = int_to_ptr.hbm [resolvable:$true] %s731_s20 }
 0x122   : > { %s738_s24 = scalar_lea.hbm %s732_s20, %s714_s11  ;;  %p743_p8 = scmp.lt.s32.totalorder %s732_s20, %s1143_s3 }
 0x123   : > { %p739_p4 = scmp.ne.s32.totalorder %s732_s20, %s738_s24  ;;  %p744_p9 = scmp.lt.s32.totalorder %s742_s30, %s738_s24 }
 0x125   : > { %p740_p5 = pnand %p739_p4, %p1088_p12  ;;  %p745_p10 = por %p744_p9, %p743_p8 }
 0x127   : > { %p741_p7 = pneg %p740_p5 }
 0x129   : > { %p746_p11 = pnand %p745_p10, %p741_p7 }
 0x12b   : > { %749 = shalt.err (!%p746_p11)
}
 0x12c   : > { %s795_s28 = smov 128   ;;  %s796_s6 = smov 8  }
 0x12d   : > { %578 = dma.vmem_to_hbm [thread:$0]  (%p1088_p12), %s1097_s7, %s656_s9, %s1099_s8, %s1079_s25, %s795_s28, %s795_s28, %s796_s6  }
 0x12e PF: > { %p669_p13 = scmp.ge.s32.totalorder %s785_s15, 2  ;;  %s587_s10 = sand.u32 1, %s773_s12  }
 0x12f   : > { %s588_s11 = scalar_lea.sflag [#allocation3], %s587_s10 }
 0x130   : > { %p666_p0 = pnand %p669_p13, %p859_p6 }
 0x132   : > { %p667_p1 = pneg %p666_p0 }
 0x134   : > { %768 = dma.done.wait (%p667_p1), %s588_s11, 256  }
 0x135   : > { %770 = vsyncadd (%p667_p1), %s588_s11, 4294967040  ;;  %p13_p2 = scmp.ge.s32.totalorder %s842_s18, 5   ;;  %s1151_s12 = smov %s777_s13 }
 0x136   : > { %s1152_s13 = smov %s781_s14  ;;  %s1153_s14 = smov %s853_s21 }
 0x137   : > { %s1154_s15 = smov %s842_s18  ;;  %15 = sbr.rel (!%p13_p2) target bundleno = 3 (0x3), region = 67 }
 0x13c   :  { %594 = vsyncpa [#allocation3], 1 }
 0x13d   :  { %596 = vsyncpa [#allocation3 + $0x1], 1 }

</bundles_post_ra>
